<compile_context>
chip_gen: v7x
topology: tpu7x:2x2x1
jax: 0.10.0
libtpu: 0.0.40
codegen_flags: <defaults>
</compile_context>

<pallas_src>
import functools

import jax
import jax.numpy as jnp
from jax import lax
from jax.experimental import pallas as pl
from jax.experimental.pallas import tpu as pltpu


def _causal_conv_kernel(w_ref, b_ref, x_ref, o_ref, xw_ref, *,
                        kt, c_in, c_out, f_out, t_tile, pad_top):
    """One (batch, time-tile) grid step.

    w_ref : (C_in, kt, F, C_out*F_out)  banded weights (VMEM, grid-invariant)
    b_ref : (1, C_out*F_out)            bias row       (VMEM, grid-invariant)
    x_ref : (C_in, T_tile, F)           input time tile (batch dim squeezed)
    o_ref : (C_out, T_tile, F_out)      output tile (NCHW block)
    xw_ref: (C_in, pad_top + T_tile, F) scratch: [..., halo(kt-1), tile(T_tile)]
    """
    nn = c_out * f_out
    halo = kt - 1
    row0 = pad_top - halo            # first row read by time tap ki = 0

    if halo > 0:
        t_idx = pl.program_id(1)

        # Causal padding: zero history at the first time tile of each batch.
        @pl.when(t_idx == 0)
        def _():
            xw_ref[:, pl.ds(row0, halo), :] = jnp.zeros(
                (c_in, halo, xw_ref.shape[-1]), xw_ref.dtype)

        # Stage the current tile behind the halo (sublane-aligned store).
        xw_ref[:, pl.ds(pad_top, t_tile), :] = x_ref[...]

    # fp32 accumulator, lane-dense (T_tile, C_out*F_out); bias folded into the
    # init instead of a separate VPU pass after the tap loop.
    acc = jnp.broadcast_to(b_ref[...], (t_tile, nn)).astype(jnp.float32)

    for c in range(c_in):
        for ki in range(kt):
            if halo > 0:
                slab = xw_ref[c, pl.ds(row0 + ki, t_tile), :]   # (T_tile, F)
            else:
                slab = x_ref[c]                                 # (T_tile, F)
            # Frequency taps + stride live inside the banded weight, so this
            # is a single dense MXU matmul per (input channel, time tap).
            acc = acc + jnp.dot(slab, w_ref[c, ki],
                                preferred_element_type=jnp.float32)

    # Split the lane-dense accumulator back into NCHW output channels
    # (kept in-kernel so the wrapper needs no output transpose / extra HBM pass).
    for o in range(c_out):
        o_ref[o] = acc[:, o * f_out:(o + 1) * f_out].astype(o_ref.dtype)

    if halo > 0:
        # Carry the last kt-1 input rows as the next time tile's halo.
        xw_ref[:, pl.ds(row0, halo), :] = (
            xw_ref[:, pl.ds(pad_top + t_tile - halo, halo), :])


def causal_conv_block(x_nchw, weight_oihw, bias, *, fstride, t_tile=None):
    """Pallas equivalent of CausalConvBlock.forward (NCHW in / NCHW out)."""
    N, C_in, T, F = x_nchw.shape
    C_out, C_in_w, kt, kf = weight_oihw.shape
    assert C_in_w == C_in
    assert F >= kf and fstride >= 1
    F_out = (F - kf) // fstride + 1
    NN = C_out * F_out

    # ---- time tiling (bounds VMEM; gives the pipeline steps to overlap) ----
    if t_tile is None:
        t_tile = T
        if T > 256:
            for cand in range(8, 257, 8):     # largest mult-of-8 divisor <= 256
                if T % cand == 0:
                    t_tile = cand
    assert t_tile == T or (t_tile % 8 == 0 and T % t_tile == 0), (t_tile, T)
    assert t_tile >= kt - 1
    num_t_tiles = T // t_tile
    pad_top = 8 * ((kt - 1 + 7) // 8) if kt > 1 else 0

    # ---- banded weights: fold frequency taps + stride into a dense matmul --
    # wb[c, ki, f_in, o*F_out + f_o] = w[o, c, ki, kj] with f_in = f_o*fstride + kj
    fo = jnp.arange(F_out)
    sel = jax.nn.one_hot(fo[:, None] * fstride + jnp.arange(kf)[None, :],
                         F, dtype=weight_oihw.dtype)            # (F_out, kf, F)
    wb = jnp.einsum('ocij,gjf->cifog', weight_oihw, sel)        # (C_in,kt,F,C_out,F_out)
    wb = wb.reshape(C_in, kt, F, NN)
    b_row = jnp.repeat(bias, F_out).reshape(1, NN)              # bias per output column

    kernel = functools.partial(
        _causal_conv_kernel, kt=kt, c_in=C_in, c_out=C_out,
        f_out=F_out, t_tile=t_tile, pad_top=pad_top)

    return pl.pallas_call(
        kernel,
        out_shape=jax.ShapeDtypeStruct((N, C_out, T, F_out), x_nchw.dtype),
        grid=(N, num_t_tiles),
        in_specs=[
            pl.BlockSpec((C_in, kt, F, NN), lambda n, t: (0, 0, 0, 0)),
            pl.BlockSpec((1, NN), lambda n, t: (0, 0)),
            pl.BlockSpec((None, C_in, t_tile, F), lambda n, t: (n, 0, t, 0)),
        ],
        out_specs=pl.BlockSpec((None, C_out, t_tile, F_out),
                               lambda n, t: (n, 0, t, 0)),
        scratch_shapes=[
            pltpu.VMEM((C_in, pad_top + t_tile, F), x_nchw.dtype),
        ],
        compiler_params=pltpu.CompilerParams(
            dimension_semantics=("parallel", "arbitrary"),
            vmem_limit_bytes=32 * 1024 * 1024),
    )(wb, b_row, x_nchw)


def _reference(x_nchw, weight_oihw, bias, *, fstride, kt):
    """Pure-JAX reference mirroring the PyTorch forward (for verification)."""
    y = lax.conv_general_dilated(
        x_nchw, weight_oihw,
        window_strides=(1, fstride),
        padding=((kt - 1, kt - 1), (0, 0)),
        dimension_numbers=("NCHW", "OIHW", "NCHW"))
    y = y + bias[None, :, None, None]
    return y[:, :, : y.shape[2] - kt + 1, :]


if __name__ == "__main__":
    key = jax.random.PRNGKey(0)
    k_x, k_w, k_b = jax.random.split(key, 3)

    # Small shapes consistent with the module: NCHW input, Conv2d params.
    # T=16 with t_tile=8 exercises the time tiling + causal halo carry.
    N, C_in, T, F = 2, 4, 16, 16
    C_out = 8
    kernel_size = (2, 3)   # (time taps, freq taps)
    fstride = 2

    x = jax.random.normal(k_x, (N, C_in, T, F), dtype=jnp.float32)
    weight = 0.1 * jax.random.normal(
        k_w, (C_out, C_in, kernel_size[0], kernel_size[1]), dtype=jnp.float32)
    bias = 0.1 * jax.random.normal(k_b, (C_out,), dtype=jnp.float32)

    out = causal_conv_block(x, weight, bias, fstride=fstride, t_tile=8)
    out = jax.block_until_ready(out)

    ref = _reference(x, weight, bias, fstride=fstride, kt=kernel_size[0])
    assert out.shape == ref.shape, (out.shape, ref.shape)
    assert jnp.allclose(out, ref, atol=2e-4, rtol=2e-4), float(
        jnp.max(jnp.abs(out - ref)))

    print("KERNEL_OK")
</pallas_src>

<mosaic_0001>
module attributes {stable_mosaic.version = 11 : i64} {
  func.func @_causal_conv_kernel(%arg0: i32, %arg1: i32, %arg2: memref<4x2x16x56xf32, #tpu.memory_space<vmem>>, %arg3: memref<1x56xf32, #tpu.memory_space<vmem>>, %arg4: memref<1x4x8x16xf32, #tpu.memory_space<vmem>>, %arg5: memref<1x8x8x7xf32, #tpu.memory_space<vmem>>, %arg6: memref<4x16x16xf32, #tpu.memory_space<vmem>>) attributes {dimension_semantics = [#tpu.dimension_semantics<parallel>, #tpu.dimension_semantics<arbitrary>], iteration_bounds = array<i64: 2, 2>, scalar_prefetch = 0 : i64, scratch_operands = 1 : i64, tpu.core_type = #tpu.core_type<tc>, window_params = [{pipeline_mode = #tpu.pipeline_mode<synchronous>, transform_indices = @transform_0, window_bounds = array<i64: 4, 2, 16, 56>}, {pipeline_mode = #tpu.pipeline_mode<synchronous>, transform_indices = @transform_1, window_bounds = array<i64: 1, 56>}, {transform_indices = @transform_2, window_bounds = array<i64: 1, 4, 8, 16>}, {transform_indices = @transform_3, window_bounds = array<i64: 1, 8, 8, 7>}]} {
    %c0_i32 = arith.constant 0 : i32
    %0 = arith.cmpi eq, %arg1, %c0_i32 : i32
    %1 = arith.extui %0 : i1 to i32
    %c0_i32_0 = arith.constant 0 : i32
    %2 = arith.cmpi ne, %1, %c0_i32_0 : i32
    scf.if %2 {
      %cst_101 = arith.constant 0.000000e+00 : f32
      %91 = vector.broadcast %cst_101 : f32 to vector<4x1x16xf32>
      %c0_102 = arith.constant 0 : index
      %c7_103 = arith.constant 7 : index
      %c0_104 = arith.constant 0 : index
      %92 = vector.load %arg6[%c0_102, %c7_103, %c0_104] : memref<4x16x16xf32, #tpu.memory_space<vmem>>, vector<4x1x16xf32>
      tpu.vector_store %arg6[%c0_102, %c7_103, %c0_104], %91 {strides = array<i32>} : memref<4x16x16xf32, #tpu.memory_space<vmem>>, vector<4x1x16xf32>,
    } else {
    }
    %c0 = arith.constant 0 : index
    %c0_1 = arith.constant 0 : index
    %c0_2 = arith.constant 0 : index
    %c0_3 = arith.constant 0 : index
    %3 = vector.load %arg4[%c0, %c0_1, %c0_2, %c0_3] : memref<1x4x8x16xf32, #tpu.memory_space<vmem>>, vector<1x4x8x16xf32>
    %4 = vector.shape_cast %3 : vector<1x4x8x16xf32> to vector<4x8x16xf32>
    %c0_4 = arith.constant 0 : index
    %c8 = arith.constant 8 : index
    %c0_5 = arith.constant 0 : index
    %5 = vector.load %arg6[%c0_4, %c8, %c0_5] : memref<4x16x16xf32, #tpu.memory_space<vmem>>, vector<4x8x16xf32>
    tpu.vector_store %arg6[%c0_4, %c8, %c0_5], %4 {strides = array<i32>} : memref<4x16x16xf32, #tpu.memory_space<vmem>>, vector<4x8x16xf32>,
    %c0_6 = arith.constant 0 : index
    %c0_7 = arith.constant 0 : index
    %6 = vector.load %arg3[%c0_6, %c0_7] : memref<1x56xf32, #tpu.memory_space<vmem>>, vector<1x56xf32>
    %7 = vector.shape_cast %6 : vector<1x56xf32> to vector<1x56xf32>
    %8 = vector.broadcast %7 : vector<1x56xf32> to vector<8x56xf32>
    %c0_8 = arith.constant 0 : index
    %c7 = arith.constant 7 : index
    %c0_9 = arith.constant 0 : index
    %9 = vector.load %arg6[%c0_8, %c7, %c0_9] : memref<4x16x16xf32, #tpu.memory_space<vmem>>, vector<1x8x16xf32>
    %10 = vector.shape_cast %9 : vector<1x8x16xf32> to vector<8x16xf32>
    %c0_10 = arith.constant 0 : index
    %c0_11 = arith.constant 0 : index
    %c0_12 = arith.constant 0 : index
    %c0_13 = arith.constant 0 : index
    %11 = vector.load %arg2[%c0_10, %c0_11, %c0_12, %c0_13] : memref<4x2x16x56xf32, #tpu.memory_space<vmem>>, vector<1x1x16x56xf32>
    %12 = vector.shape_cast %11 : vector<1x1x16x56xf32> to vector<16x56xf32>
    %cst = arith.constant dense<0.000000e+00> : vector<8x56xf32>
    %13 = tpu.matmul %10, %12, %cst {dimension_numbers = #tpu.dot_dimension_numbers<[1], [0], [0], [1], [0, 0, 1, 1], [], []>} : vector<8x16xf32>, vector<16x56xf32>, vector<8x56xf32> -> vector<8x56xf32>
    %14 = arith.addf %8, %13 : vector<8x56xf32>
    %c0_14 = arith.constant 0 : index
    %c8_15 = arith.constant 8 : index
    %c0_16 = arith.constant 0 : index
    %15 = vector.load %arg6[%c0_14, %c8_15, %c0_16] : memref<4x16x16xf32, #tpu.memory_space<vmem>>, vector<1x8x16xf32>
    %16 = vector.shape_cast %15 : vector<1x8x16xf32> to vector<8x16xf32>
    %c0_17 = arith.constant 0 : index
    %c1 = arith.constant 1 : index
    %c0_18 = arith.constant 0 : index
    %c0_19 = arith.constant 0 : index
    %17 = vector.load %arg2[%c0_17, %c1, %c0_18, %c0_19] : memref<4x2x16x56xf32, #tpu.memory_space<vmem>>, vector<1x1x16x56xf32>
    %18 = vector.shape_cast %17 : vector<1x1x16x56xf32> to vector<16x56xf32>
    %cst_20 = arith.constant dense<0.000000e+00> : vector<8x56xf32>
    %19 = tpu.matmul %16, %18, %cst_20 {dimension_numbers = #tpu.dot_dimension_numbers<[1], [0], [0], [1], [0, 0, 1, 1], [], []>} : vector<8x16xf32>, vector<16x56xf32>, vector<8x56xf32> -> vector<8x56xf32>
    %20 = arith.addf %14, %19 : vector<8x56xf32>
    %c1_21 = arith.constant 1 : index
    %c7_22 = arith.constant 7 : index
    %c0_23 = arith.constant 0 : index
    %21 = vector.load %arg6[%c1_21, %c7_22, %c0_23] : memref<4x16x16xf32, #tpu.memory_space<vmem>>, vector<1x8x16xf32>
    %22 = vector.shape_cast %21 : vector<1x8x16xf32> to vector<8x16xf32>
    %c1_24 = arith.constant 1 : index
    %c0_25 = arith.constant 0 : index
    %c0_26 = arith.constant 0 : index
    %c0_27 = arith.constant 0 : index
    %23 = vector.load %arg2[%c1_24, %c0_25, %c0_26, %c0_27] : memref<4x2x16x56xf32, #tpu.memory_space<vmem>>, vector<1x1x16x56xf32>
    %24 = vector.shape_cast %23 : vector<1x1x16x56xf32> to vector<16x56xf32>
    %cst_28 = arith.constant dense<0.000000e+00> : vector<8x56xf32>
    %25 = tpu.matmul %22, %24, %cst_28 {dimension_numbers = #tpu.dot_dimension_numbers<[1], [0], [0], [1], [0, 0, 1, 1], [], []>} : vector<8x16xf32>, vector<16x56xf32>, vector<8x56xf32> -> vector<8x56xf32>
    %26 = arith.addf %20, %25 : vector<8x56xf32>
    %c1_29 = arith.constant 1 : index
    %c8_30 = arith.constant 8 : index
    %c0_31 = arith.constant 0 : index
    %27 = vector.load %arg6[%c1_29, %c8_30, %c0_31] : memref<4x16x16xf32, #tpu.memory_space<vmem>>, vector<1x8x16xf32>
    %28 = vector.shape_cast %27 : vector<1x8x16xf32> to vector<8x16xf32>
    %c1_32 = arith.constant 1 : index
    %c1_33 = arith.constant 1 : index
    %c0_34 = arith.constant 0 : index
    %c0_35 = arith.constant 0 : index
    %29 = vector.load %arg2[%c1_32, %c1_33, %c0_34, %c0_35] : memref<4x2x16x56xf32, #tpu.memory_space<vmem>>, vector<1x1x16x56xf32>
    %30 = vector.shape_cast %29 : vector<1x1x16x56xf32> to vector<16x56xf32>
    %cst_36 = arith.constant dense<0.000000e+00> : vector<8x56xf32>
    %31 = tpu.matmul %28, %30, %cst_36 {dimension_numbers = #tpu.dot_dimension_numbers<[1], [0], [0], [1], [0, 0, 1, 1], [], []>} : vector<8x16xf32>, vector<16x56xf32>, vector<8x56xf32> -> vector<8x56xf32>
    %32 = arith.addf %26, %31 : vector<8x56xf32>
    %c2 = arith.constant 2 : index
    %c7_37 = arith.constant 7 : index
    %c0_38 = arith.constant 0 : index
    %33 = vector.load %arg6[%c2, %c7_37, %c0_38] : memref<4x16x16xf32, #tpu.memory_space<vmem>>, vector<1x8x16xf32>
    %34 = vector.shape_cast %33 : vector<1x8x16xf32> to vector<8x16xf32>
    %c2_39 = arith.constant 2 : index
    %c0_40 = arith.constant 0 : index
    %c0_41 = arith.constant 0 : index
    %c0_42 = arith.constant 0 : index
    %35 = vector.load %arg2[%c2_39, %c0_40, %c0_41, %c0_42] : memref<4x2x16x56xf32, #tpu.memory_space<vmem>>, vector<1x1x16x56xf32>
    %36 = vector.shape_cast %35 : vector<1x1x16x56xf32> to vector<16x56xf32>
    %cst_43 = arith.constant dense<0.000000e+00> : vector<8x56xf32>
    %37 = tpu.matmul %34, %36, %cst_43 {dimension_numbers = #tpu.dot_dimension_numbers<[1], [0], [0], [1], [0, 0, 1, 1], [], []>} : vector<8x16xf32>, vector<16x56xf32>, vector<8x56xf32> -> vector<8x56xf32>
    %38 = arith.addf %32, %37 : vector<8x56xf32>
    %c2_44 = arith.constant 2 : index
    %c8_45 = arith.constant 8 : index
    %c0_46 = arith.constant 0 : index
    %39 = vector.load %arg6[%c2_44, %c8_45, %c0_46] : memref<4x16x16xf32, #tpu.memory_space<vmem>>, vector<1x8x16xf32>
    %40 = vector.shape_cast %39 : vector<1x8x16xf32> to vector<8x16xf32>
    %c2_47 = arith.constant 2 : index
    %c1_48 = arith.constant 1 : index
    %c0_49 = arith.constant 0 : index
    %c0_50 = arith.constant 0 : index
    %41 = vector.load %arg2[%c2_47, %c1_48, %c0_49, %c0_50] : memref<4x2x16x56xf32, #tpu.memory_space<vmem>>, vector<1x1x16x56xf32>
    %42 = vector.shape_cast %41 : vector<1x1x16x56xf32> to vector<16x56xf32>
    %cst_51 = arith.constant dense<0.000000e+00> : vector<8x56xf32>
    %43 = tpu.matmul %40, %42, %cst_51 {dimension_numbers = #tpu.dot_dimension_numbers<[1], [0], [0], [1], [0, 0, 1, 1], [], []>} : vector<8x16xf32>, vector<16x56xf32>, vector<8x56xf32> -> vector<8x56xf32>
    %44 = arith.addf %38, %43 : vector<8x56xf32>
    %c3 = arith.constant 3 : index
    %c7_52 = arith.constant 7 : index
    %c0_53 = arith.constant 0 : index
    %45 = vector.load %arg6[%c3, %c7_52, %c0_53] : memref<4x16x16xf32, #tpu.memory_space<vmem>>, vector<1x8x16xf32>
    %46 = vector.shape_cast %45 : vector<1x8x16xf32> to vector<8x16xf32>
    %c3_54 = arith.constant 3 : index
    %c0_55 = arith.constant 0 : index
    %c0_56 = arith.constant 0 : index
    %c0_57 = arith.constant 0 : index
    %47 = vector.load %arg2[%c3_54, %c0_55, %c0_56, %c0_57] : memref<4x2x16x56xf32, #tpu.memory_space<vmem>>, vector<1x1x16x56xf32>
    %48 = vector.shape_cast %47 : vector<1x1x16x56xf32> to vector<16x56xf32>
    %cst_58 = arith.constant dense<0.000000e+00> : vector<8x56xf32>
    %49 = tpu.matmul %46, %48, %cst_58 {dimension_numbers = #tpu.dot_dimension_numbers<[1], [0], [0], [1], [0, 0, 1, 1], [], []>} : vector<8x16xf32>, vector<16x56xf32>, vector<8x56xf32> -> vector<8x56xf32>
    %50 = arith.addf %44, %49 : vector<8x56xf32>
    %c3_59 = arith.constant 3 : index
    %c8_60 = arith.constant 8 : index
    %c0_61 = arith.constant 0 : index
    %51 = vector.load %arg6[%c3_59, %c8_60, %c0_61] : memref<4x16x16xf32, #tpu.memory_space<vmem>>, vector<1x8x16xf32>
    %52 = vector.shape_cast %51 : vector<1x8x16xf32> to vector<8x16xf32>
    %c3_62 = arith.constant 3 : index
    %c1_63 = arith.constant 1 : index
    %c0_64 = arith.constant 0 : index
    %c0_65 = arith.constant 0 : index
    %53 = vector.load %arg2[%c3_62, %c1_63, %c0_64, %c0_65] : memref<4x2x16x56xf32, #tpu.memory_space<vmem>>, vector<1x1x16x56xf32>
    %54 = vector.shape_cast %53 : vector<1x1x16x56xf32> to vector<16x56xf32>
    %cst_66 = arith.constant dense<0.000000e+00> : vector<8x56xf32>
    %55 = tpu.matmul %52, %54, %cst_66 {dimension_numbers = #tpu.dot_dimension_numbers<[1], [0], [0], [1], [0, 0, 1, 1], [], []>} : vector<8x16xf32>, vector<16x56xf32>, vector<8x56xf32> -> vector<8x56xf32>
    %56 = arith.addf %50, %55 : vector<8x56xf32>
    %57 = vector.extract_strided_slice %56 {offsets = [0, 0], sizes = [8, 7], strides = [1, 1]} : vector<8x56xf32> to vector<8x7xf32>
    %c0_67 = arith.constant 0 : index
    %c0_68 = arith.constant 0 : index
    %c0_69 = arith.constant 0 : index
    %c0_70 = arith.constant 0 : index
    %58 = vector.load %arg5[%c0_67, %c0_68, %c0_69, %c0_70] : memref<1x8x8x7xf32, #tpu.memory_space<vmem>>, vector<1x1x8x7xf32>
    %59 = vector.shape_cast %58 : vector<1x1x8x7xf32> to vector<8x7xf32>
    %60 = vector.shape_cast %57 : vector<8x7xf32> to vector<1x1x8x7xf32>
    tpu.vector_store %arg5[%c0_67, %c0_68, %c0_69, %c0_70], %60 {strides = array<i32>} : memref<1x8x8x7xf32, #tpu.memory_space<vmem>>, vector<1x1x8x7xf32>,
    %61 = vector.extract_strided_slice %56 {offsets = [0, 7], sizes = [8, 7], strides = [1, 1]} : vector<8x56xf32> to vector<8x7xf32>
    %c0_71 = arith.constant 0 : index
    %c1_72 = arith.constant 1 : index
    %c0_73 = arith.constant 0 : index
    %c0_74 = arith.constant 0 : index
    %62 = vector.load %arg5[%c0_71, %c1_72, %c0_73, %c0_74] : memref<1x8x8x7xf32, #tpu.memory_space<vmem>>, vector<1x1x8x7xf32>
    %63 = vector.shape_cast %62 : vector<1x1x8x7xf32> to vector<8x7xf32>
    %64 = vector.shape_cast %61 : vector<8x7xf32> to vector<1x1x8x7xf32>
    tpu.vector_store %arg5[%c0_71, %c1_72, %c0_73, %c0_74], %64 {strides = array<i32>} : memref<1x8x8x7xf32, #tpu.memory_space<vmem>>, vector<1x1x8x7xf32>,
    %65 = vector.extract_strided_slice %56 {offsets = [0, 14], sizes = [8, 7], strides = [1, 1]} : vector<8x56xf32> to vector<8x7xf32>
    %c0_75 = arith.constant 0 : index
    %c2_76 = arith.constant 2 : index
    %c0_77 = arith.constant 0 : index
    %c0_78 = arith.constant 0 : index
    %66 = vector.load %arg5[%c0_75, %c2_76, %c0_77, %c0_78] : memref<1x8x8x7xf32, #tpu.memory_space<vmem>>, vector<1x1x8x7xf32>
    %67 = vector.shape_cast %66 : vector<1x1x8x7xf32> to vector<8x7xf32>
    %68 = vector.shape_cast %65 : vector<8x7xf32> to vector<1x1x8x7xf32>
    tpu.vector_store %arg5[%c0_75, %c2_76, %c0_77, %c0_78], %68 {strides = array<i32>} : memref<1x8x8x7xf32, #tpu.memory_space<vmem>>, vector<1x1x8x7xf32>,
    %69 = vector.extract_strided_slice %56 {offsets = [0, 21], sizes = [8, 7], strides = [1, 1]} : vector<8x56xf32> to vector<8x7xf32>
    %c0_79 = arith.constant 0 : index
    %c3_80 = arith.constant 3 : index
    %c0_81 = arith.constant 0 : index
    %c0_82 = arith.constant 0 : index
    %70 = vector.load %arg5[%c0_79, %c3_80, %c0_81, %c0_82] : memref<1x8x8x7xf32, #tpu.memory_space<vmem>>, vector<1x1x8x7xf32>
    %71 = vector.shape_cast %70 : vector<1x1x8x7xf32> to vector<8x7xf32>
    %72 = vector.shape_cast %69 : vector<8x7xf32> to vector<1x1x8x7xf32>
    tpu.vector_store %arg5[%c0_79, %c3_80, %c0_81, %c0_82], %72 {strides = array<i32>} : memref<1x8x8x7xf32, #tpu.memory_space<vmem>>, vector<1x1x8x7xf32>,
    %73 = vector.extract_strided_slice %56 {offsets = [0, 28], sizes = [8, 7], strides = [1, 1]} : vector<8x56xf32> to vector<8x7xf32>
    %c0_83 = arith.constant 0 : index
    %c4 = arith.constant 4 : index
    %c0_84 = arith.constant 0 : index
    %c0_85 = arith.constant 0 : index
    %74 = vector.load %arg5[%c0_83, %c4, %c0_84, %c0_85] : memref<1x8x8x7xf32, #tpu.memory_space<vmem>>, vector<1x1x8x7xf32>
    %75 = vector.shape_cast %74 : vector<1x1x8x7xf32> to vector<8x7xf32>
    %76 = vector.shape_cast %73 : vector<8x7xf32> to vector<1x1x8x7xf32>
    tpu.vector_store %arg5[%c0_83, %c4, %c0_84, %c0_85], %76 {strides = array<i32>} : memref<1x8x8x7xf32, #tpu.memory_space<vmem>>, vector<1x1x8x7xf32>,
    %77 = vector.extract_strided_slice %56 {offsets = [0, 35], sizes = [8, 7], strides = [1, 1]} : vector<8x56xf32> to vector<8x7xf32>
    %c0_86 = arith.constant 0 : index
    %c5 = arith.constant 5 : index
    %c0_87 = arith.constant 0 : index
    %c0_88 = arith.constant 0 : index
    %78 = vector.load %arg5[%c0_86, %c5, %c0_87, %c0_88] : memref<1x8x8x7xf32, #tpu.memory_space<vmem>>, vector<1x1x8x7xf32>
    %79 = vector.shape_cast %78 : vector<1x1x8x7xf32> to vector<8x7xf32>
    %80 = vector.shape_cast %77 : vector<8x7xf32> to vector<1x1x8x7xf32>
    tpu.vector_store %arg5[%c0_86, %c5, %c0_87, %c0_88], %80 {strides = array<i32>} : memref<1x8x8x7xf32, #tpu.memory_space<vmem>>, vector<1x1x8x7xf32>,
    %81 = vector.extract_strided_slice %56 {offsets = [0, 42], sizes = [8, 7], strides = [1, 1]} : vector<8x56xf32> to vector<8x7xf32>
    %c0_89 = arith.constant 0 : index
    %c6 = arith.constant 6 : index
    %c0_90 = arith.constant 0 : index
    %c0_91 = arith.constant 0 : index
    %82 = vector.load %arg5[%c0_89, %c6, %c0_90, %c0_91] : memref<1x8x8x7xf32, #tpu.memory_space<vmem>>, vector<1x1x8x7xf32>
    %83 = vector.shape_cast %82 : vector<1x1x8x7xf32> to vector<8x7xf32>
    %84 = vector.shape_cast %81 : vector<8x7xf32> to vector<1x1x8x7xf32>
    tpu.vector_store %arg5[%c0_89, %c6, %c0_90, %c0_91], %84 {strides = array<i32>} : memref<1x8x8x7xf32, #tpu.memory_space<vmem>>, vector<1x1x8x7xf32>,
    %85 = vector.extract_strided_slice %56 {offsets = [0, 49], sizes = [8, 7], strides = [1, 1]} : vector<8x56xf32> to vector<8x7xf32>
    %c0_92 = arith.constant 0 : index
    %c7_93 = arith.constant 7 : index
    %c0_94 = arith.constant 0 : index
    %c0_95 = arith.constant 0 : index
    %86 = vector.load %arg5[%c0_92, %c7_93, %c0_94, %c0_95] : memref<1x8x8x7xf32, #tpu.memory_space<vmem>>, vector<1x1x8x7xf32>
    %87 = vector.shape_cast %86 : vector<1x1x8x7xf32> to vector<8x7xf32>
    %88 = vector.shape_cast %85 : vector<8x7xf32> to vector<1x1x8x7xf32>
    tpu.vector_store %arg5[%c0_92, %c7_93, %c0_94, %c0_95], %88 {strides = array<i32>} : memref<1x8x8x7xf32, #tpu.memory_space<vmem>>, vector<1x1x8x7xf32>,
    %c0_96 = arith.constant 0 : index
    %c15 = arith.constant 15 : index
    %c0_97 = arith.constant 0 : index
    %89 = vector.load %arg6[%c0_96, %c15, %c0_97] : memref<4x16x16xf32, #tpu.memory_space<vmem>>, vector<4x1x16xf32>
    %c0_98 = arith.constant 0 : index
    %c7_99 = arith.constant 7 : index
    %c0_100 = arith.constant 0 : index
    %90 = vector.load %arg6[%c0_98, %c7_99, %c0_100] : memref<4x16x16xf32, #tpu.memory_space<vmem>>, vector<4x1x16xf32>
    tpu.vector_store %arg6[%c0_98, %c7_99, %c0_100], %89 {strides = array<i32>} : memref<4x16x16xf32, #tpu.memory_space<vmem>>, vector<4x1x16xf32>,
    return
  }
  func.func @transform_0(%arg0: i32, %arg1: i32) -> (i32, i32, i32, i32) {
    %c0_i32 = arith.constant 0 : i32
    %c0_i32_0 = arith.constant 0 : i32
    %c0_i32_1 = arith.constant 0 : i32
    %c0_i32_2 = arith.constant 0 : i32
    %c0_i32_3 = arith.constant 0 : i32
    return %c0_i32, %c0_i32_0, %c0_i32_1, %c0_i32_2 : i32, i32, i32, i32
  }
  func.func @transform_1(%arg0: i32, %arg1: i32) -> (i32, i32) {
    %c0_i32 = arith.constant 0 : i32
    %c0_i32_0 = arith.constant 0 : i32
    %c0_i32_1 = arith.constant 0 : i32
    return %c0_i32, %c0_i32_0 : i32, i32
  }
  func.func @transform_2(%arg0: i32, %arg1: i32) -> (i32, i32, i32, i32) {
    %c0_i32 = arith.constant 0 : i32
    %c0_i32_0 = arith.constant 0 : i32
    %c0_i32_1 = arith.constant 0 : i32
    return %arg0, %c0_i32, %arg1, %c0_i32_0 : i32, i32, i32, i32
  }
  func.func @transform_3(%arg0: i32, %arg1: i32) -> (i32, i32, i32, i32) {
    %c0_i32 = arith.constant 0 : i32
    %c0_i32_0 = arith.constant 0 : i32
    %c0_i32_1 = arith.constant 0 : i32
    return %arg0, %c0_i32, %arg1, %c0_i32_0 : i32, i32, i32, i32
  }
}

</mosaic_0001>

<bundles_post_ra>
// kernel: tpu_custom_call.1
= control target key start
LH: loop header
LB: loop body
LE: loop exit
PB: predicated region body
PF: predicated region fallthrough
CT: control target
= control target key end

     0   :  { %8 = vsyncpa [#allocation4], 0  ;;  %s1770_s0 = inlined_call_operand.hbm [shape: f32[4,2,16,56], index: 0, kind: input, shape index: {}]   ;;  %s1771_s1 = inlined_call_operand.vmem [shape: f32[1,56], index: 1, kind: input, shape index: {}]   ;;  %s1772_s2 = inlined_call_operand.hbm [shape: f32[2,4,16,16], index: 2, kind: input, shape index: {}]   ;;  %s1773_s3 = inlined_call_operand.vmem [shape: f32[2,8,16,7], index: 3, kind: output, shape index: {}]  }
   0x1   :  { %9 = vsyncpa [#allocation6], 0 }
   0x2   :  { %11 = vsyncpa [#allocation6 + $0x1], 0  ;;  %s1489_s12 = smov 0   ;;  %s1491_s13 = smov 0  }
   0x3   :  { %s1493_s14 = smov 0   ;;  %s1495_s15 = smov 0  }
   0x4   :  { %s1497_s16 = smov 0   ;;  %s1499_s17 = smov 0  }
   0x5   :  { %s1501_s18 = smov 0   ;;  %s1503_s19 = smov 0  }
   0x6 LB: > { %s1075_s20 = sadd.s32 4294967295, %s1451_s19   ;;  %p87_p0 = scmp.ne.s32.totalorder %s1431_s14, %s1427_s13  ;;  %s1451_s19 = sphi %s1503_s19, %s17_s19   ;;  %s1447_s18 = sphi %s1501_s18, %s1802_s18   ;;  %s1443_s17 = sphi %s1499_s17, %s1801_s17   ;;  %s1439_s16 = sphi %s1497_s16, %s1800_s16   ;;  %s1435_s15 = sphi %s1495_s15, %s1799_s15   ;;  %s1431_s14 = sphi %s1493_s14, %s1798_s14   ;;  %s1427_s13 = sphi %s1491_s13, %s1797_s13   ;;  %s1423_s12 = sphi %s1489_s12, %s1796_s12  }
   0x7   : > { %p88_p1 = scmp.eq.s32.totalorder %s1451_s19, 0  ;;  %p93_p2 = scmp.ne.s32.totalorder %s1427_s13, %s1423_s12 }
   0x8   : > { %p1533_p3 = scmp.eq.s32.totalorder %s1075_s20, 0  ;;  %p119_p5 = scmp.eq.s32.totalorder %s1075_s20, 3 }
   0x9   : > { %p1537_p4 = por %p88_p1, %p87_p0  ;;  %p1077_p7 = scmp.ge.s32.totalorder %s1451_s19, 1 }
   0xa   : > { %s1781_s22 = scalar_select %p1533_p3, 1, 0 }
   0xb   : > { %p1543_p6 = por %p1533_p3, %p93_p2  ;;  %p1548_p8 = por %p119_p5, %p87_p0 }
   0xc   : > { %p132_p9 = scmp.lt.s32.totalorder %s1451_s19, 5  ;;  %s1453_s27 = smov [#allocation3]  }
   0xd   : > { %s1783_s24 = scalar_select %p1543_p6, 1, 0 }
   0xe   : > { %s1784_s25 = scalar_select %p1548_p8, 1, 0 }
   0xf   : > { %p1553_p10 = pnand %p1077_p7, %p132_p9  ;;  %s144_s28 = sshll.u32 %s1453_s27, 4  ;;  %s145_s28 = int_to_ptr.vmem [resolvable:$true] %s144_s28 }
  0x10   : > { %p1242_p12 = scmp.lt.s32.totalorder %s1451_s19, 4  ;;  %s1323_s6 = scalar_lea.hbm %s1770_s0, 2048 }
  0x11   : > { %s1785_s26 = scalar_select %p1553_p10, 1, 0 }
  0x12   : > { %p1233_p11 = pneg %p1553_p10  ;;  %p1568_p0 = pnand %p1242_p12, %p1537_p4 }
  0x13   : > { %p1324_p1 = scmp.ne.s32.totalorder %s1770_s0, %s1323_s6  ;;  %p1330_p9 = scmp.lt.u32.totalorder %s1323_s6, %s1770_s0 }
  0x14   : > { %p1562_p13 = pnand %p1233_p11, %p1533_p3 }
  0x15   : > { %s1787_s30 = scalar_select %p1568_p0, 1, 0 }
  0x16   : > { %p1325_p2 = pneg %p1562_p13 }
  0x18   : > { %p1326_p5 = pnand %p1325_p2, %p1324_p1 }
  0x1a   : > { %p1327_p7 = pneg %p1326_p5 }
  0x1c   : > { %p1332_p4 = pnand %p1330_p9, %p1327_p7 }
  0x1e   : > { %1335 = shalt.err (!%p1332_p4)
}
  0x1f   : > { %s1336_s11 = scalar_lea.vmem %s145_s28, 2048  ;;  %p1344_p6 = scmp.lt.s32.totalorder %s145_s28, %s145_s28 }
  0x20   : > { %p1337_p11 = scmp.ne.s32.totalorder %s145_s28, %s1336_s11  ;;  %p1345_p3 = scmp.lt.s32.totalorder %s1336_s11, %s1336_s11 }
  0x22   : > { %p1339_p12 = pnand %p1337_p11, %p1325_p2  ;;  %p1346_p10 = por %p1345_p3, %p1344_p6 }
  0x24   : > { %p1340_p8 = pneg %p1339_p12 }
  0x26   : > { %p1347_p0 = pnand %p1346_p10, %p1340_p8 }
  0x28   : > { %1350 = shalt.err (!%p1347_p0)
}
  0x29   : > { %s1779_s12 = smov 128   ;;  %s1780_s20 = smov 8  }
  0x2a   : > { %1236 = dma.hbm_to_vmem [thread:$0]  (!%p1562_p13), %s1770_s0, 2048, %s145_s28, [#allocation4], %s1779_s12, %s1779_s12, %s1780_s20  }
  0x2b   : > { %s26_s4 = sadd.s32 1, %s1443_s17  ;;  %s29_s5 = sadd.s32 1, %s1447_s18 }
  0x2c   : > { %p27_p3 = scmp.ge.s32.totalorder %s26_s4, 2  ;;  %s161_s6 = sand.u32 1, %s1431_s14  }
  0x2d   : > { %s1080_s7 = sshll.u32 %s161_s6, 5  ;;  %s1081_s29 = sshll.u32 %s1447_s18, 3 }
  0x2e   : > { %s1804_s4 = smov (%p27_p3, %s26_s4), 0  ;;  %s1806_s5 = smov (!%p27_p3, %s29_s5), %s1447_s18 }
  0x2f   : > { %s76_s8 = ssub.s32 %s1443_s17, %s1804_s4  ;;  %p31_p6 = scmp.ge.s32.totalorder %s1806_s5, 2 }
  0x30   : > { %s170_s9 = sadd.s32 %s1443_s17, %s1081_s29  ;;  %s165_s10 = scalar_lea.vmem [#allocation5], %s1080_s7 }
  0x31   : > { %s173_s11 = sshll.u32 %s165_s10, 4  ;;  %s1808_s5 = smov (%p31_p6, %s1806_s5), 0  ;;  %s1603_s11 = int_to_ptr.vmem [resolvable:$true] %s173_s11 }
  0x32   : > { %s1082_s28 = sshll.u32 %s170_s9, 7  ;;  %s75_s23 = ssub.s32 %s1447_s18, %s1808_s5 }
  0x33   : > { %s1610_s12 = scalar_lea.hbm %s1772_s2, %s1082_s28  ;;  %s1612_s20 = sor.u32 %s76_s8, %s75_s23 }
  0x34   : > { %p78_p8 = scmp.eq.s32.totalorder %s1612_s20, 0  ;;  %s1615_s7 = scalar_lea.sflag [#allocation6], %s161_s6 }
  0x35   : > { %s1351_s29 = scalar_lea.hbm %s1610_s12, 512  ;;  %p1788_p13 = scmp.ne.s32.totalorder %s1787_s30, 0 }
  0x36   : > { %p1352_p10 = scmp.ne.s32.totalorder %s1610_s12, %s1351_s29  ;;  %s1356_s10 = scalar_lea.hbm %s1772_s2, 2048 }
  0x37   : > { %p1353_p0 = pneg %p1788_p13  ;;  %p1357_p5 = scmp.lt.u32.totalorder %s1610_s12, %s1772_s2 }
  0x38   : > { %p1358_p7 = scmp.lt.u32.totalorder %s1356_s10, %s1351_s29  ;;  %p1360_p4 = scmp.lt.u32.totalorder %s1351_s29, %s1610_s12 }
  0x39   : > { %p1354_p1 = pnand %p1353_p0, %p1352_p10 }
  0x3a   : > { %p1359_p9 = por %p1358_p7, %p1357_p5 }
  0x3b   : > { %p1355_p2 = pneg %p1354_p1 }
  0x3c   : > { %p1361_p11 = por %p1360_p4, %p1359_p9 }
  0x3e   : > { %p1362_p12 = pnand %p1361_p11, %p1355_p2 }
  0x40   : > { %1365 = shalt.err (!%p1362_p12)
}
  0x41   : > { %s1366_s6 = scalar_lea.vmem %s1603_s11, 512  ;;  %s1456_s8 = smov [#allocation5]  }
  0x42   : > { %p1367_p3 = scmp.ne.s32.totalorder %s1603_s11, %s1366_s6  ;;  %s1371_s23 = sshll.u32 %s1456_s8, 4  ;;  %s1372_s23 = int_to_ptr.vmem [resolvable:$false] %s1371_s23 }
  0x43   : > { %s1373_s21 = scalar_lea.vmem %s1372_s23, 1024  ;;  %p1374_p1 = scmp.lt.s32.totalorder %s1603_s11, %s1372_s23 }
  0x44   : > { %p1369_p6 = pnand %p1367_p3, %p1353_p0  ;;  %p1375_p5 = scmp.lt.s32.totalorder %s1373_s21, %s1366_s6 }
  0x46   : > { %p1370_p10 = pneg %p1369_p6  ;;  %p1376_p7 = por %p1375_p5, %p1374_p1 }
  0x48   : > { %p1377_p9 = pnand %p1376_p7, %p1370_p10 }
  0x4a   : > { %1380 = shalt.err (!%p1377_p9)
}
  0x4b   : > { %s1457_s29 = smov 256   ;;  %s1789_s9 = smov 8  }
  0x4c   : > { %s1790_s10 = smov 128   ;;  %s1791_s28 = sadd.s32 1, %s1431_s14 }
  0x4d   : > { %1240 = dma.hbm_to_vmem [thread:$0]  (!%p1788_p13), %s1610_s12, 512, %s1603_s11, %s1615_s7, %s1457_s29, %s1790_s10, %s1789_s9  }
  0x4e   : > { %s1650_s27 = scalar_select %p78_p8, %s1431_s14, %s1791_s28  }
  0x4f   : > { %p1792_p0 = scmp.ne.s32.totalorder %s1785_s26, 0 }
  0x50   : > { %p1793_p2 = scmp.ne.s32.totalorder (!%p1792_p0), %s1781_s22, 0 }
  0x51   : > { %185 = sbr.rel (%p1792_p0) target bundleno = 489 (0x1e9), region = 32 }
  0x58   : > { %1414 = dma.done.wait (%p1793_p2), [#allocation4], 2048  }
  0x59   : > { %1416 = vsyncadd (%p1793_p2), [#allocation4], 4294965248  ;;  %s191_s30 = sand.u32 1, %s1427_s13   ;;  %p1794_p13 = scmp.ne.s32.totalorder %s1783_s24, 0 }
  0x5a   : > { %s1085_s6 = sshll.u32 %s191_s30, 5  ;;  %s192_s8 = scalar_lea.sflag [#allocation6], %s191_s30 }
  0x5b   : > { %s1659_s23 = scalar_lea.vmem [#allocation5], %s1085_s6 }
  0x5c   : > { %1418 = dma.done.wait (%p1794_p13), %s192_s8, 512  }
  0x5d   : > { %1420 = vsyncadd (%p1794_p13), %s192_s8, 4294966784  ;;  %s1086_s26 = sshll.u32 %s191_s30, 6  ;;  %p1087_p8 = scmp.ne.s32.totalorder %s1435_s15, 0 }
  0x5e   : > { %s1665_s12 = scalar_lea.vmem [#allocation7], %s1086_s26  ;;  %vm221_vm0 = vcmask (!%p1087_p8), 122880   ;;  %v1458_v0 = vmov (!%p1087_p8), 0.0  }
  0x5f   : > { %220 = sbr.rel (%p1087_p8) target bundleno = 102 (0x66), region = 44  ;;  %222 = vst.msk [vmem:[#allocation2 + $0x7] sm:$0x1] (!%p1087_p8), %vm221_vm0, %v1458_v0  ;;  %223 = vst.msk [vmem:[#allocation2 + $0x17] sm:$0x1] (!%p1087_p8), %vm221_vm0, %v1458_v0 }
  0x60   : > { %224 = vst.msk [vmem:[#allocation2 + $0x27] sm:$0x1] (!%p1087_p8), %vm221_vm0, %v1458_v0  ;;  %225 = vst.msk [vmem:[#allocation2 + $0x37] sm:$0x1] (!%p1087_p8), %vm221_vm0, %v1458_v0 }
  0x66 PF: > { %v243_v1 = vld [vmem:[#allocation3] sm:$0xff]  ;;  %v244_v2 = vld [vmem:[#allocation3 + $0x8] sm:$0xff]  ;;  %v1459_v4 = vmov 0.0|0.0   ;;  %vm230_vm1 = vcmask 130048   ;;  %vm1460_vm2 = vmmov 0   ;;  %v1461_v9 = vmov 0.0  }
  0x67   : > { %v557_v3 = vld [vmem:[#allocation3 + $0x40] sm:$0xff]  ;;  %1189 = vmatprep.subr.bf16.mxu1 %v1459_v4  ;;  %v1190_v5 = vpack.c.bf16 %v244_v2, %v243_v1  ;;  %1201 = vmatprep.subr.bf16.mxu0 %v1459_v4  ;;  %v558_v6 = vld [vmem:[#allocation3 + $0x48] sm:$0xff]  ;;  %v228_v10 = vld [vmem:[%s1659_s23 + $0x10] sm:$0xff]  ;;  %vm910_vm3 = vcmask 122880   ;;  %vm868_vm4 = vcmask 56320   ;;  %s1462_s20 = smov 107  }
  0x68   : > { %v226_v7 = vld [vmem:[%s1659_s23] sm:$0xff]  ;;  %v1202_v8 = vpack.c.bf16 %v558_v6, %v557_v3  ;;  %1137 = vmatprep.mubr.msk.f32.mxu1 %vm1460_vm2, %v1461_v9  ;;  %1165 = vmatprep.mubr.msk.f32.mxu0 %vm1460_vm2, %v1461_v9  ;;  %233 = vst.msk [vmem:[#allocation2 + $0x28] sm:$0xff] %vm230_vm1, %v228_v10  ;;  %v321_v11 = vld [vmem:[#allocation3 + $0x10] sm:$0xff]  ;;  %v322_v12 = vld [vmem:[#allocation3 + $0x18] sm:$0xff]  ;;  %s1463_s11 = smov 121   ;;  %s1464_s7 = smov 100  }
  0x69   : > { %231 = vst.msk [vmem:[#allocation2 + $0x8] sm:$0xff] %vm230_vm1, %v226_v7  ;;  %1191 = vmatpush3.bf16.msra.mxu1 %v1190_v5  ;;  %v227_v13 = vld [vmem:[%s1659_s23 + $0x8] sm:$0xff]  ;;  %v635_v14 = vld [vmem:[#allocation3 + $0x50] sm:$0xff]  ;;  %v636_v15 = vld [vmem:[#allocation3 + $0x58] sm:$0xff]  ;;  %v1193_v17 = vpack.c.bf16 %v322_v12, %v321_v11  ;;  %s1465_s21 = smov 114   ;;  %s1466_s29 = smov 86  }
  0x6a   : > { %1203 = vmatpush3.bf16.msra.mxu0 %v1202_v8  ;;  %1192 = vmatprep.subr.bf16.mxu1 %v1459_v4  ;;  %232 = vst.msk [vmem:[#allocation2 + $0x18] sm:$0xff] %vm230_vm1, %v227_v13  ;;  %v229_v16 = vld [vmem:[%s1659_s23 + $0x18] sm:$0xff]  ;;  %v1205_v18 = vpack.c.bf16 %v636_v15, %v635_v14  ;;  %v400_v23 = vld [vmem:[#allocation3 + $0x20] sm:$0xff]  ;;  %v401_v24 = vld [vmem:[#allocation3 + $0x28] sm:$0xff]  ;;  %s1467_s9 = smov 93   ;;  %s1468_s10 = smov 79  }
  0x6b   : > { %1204 = vmatprep.subr.bf16.mxu0 %v1459_v4  ;;  %234 = vst.msk [vmem:[#allocation2 + $0x38] sm:$0xff] %vm230_vm1, %v229_v16  ;;  %v714_v25 = vld [vmem:[#allocation3 + $0x60] sm:$0xff]  ;;  %v715_v28 = vld [vmem:[#allocation3 + $0x68] sm:$0xff]  ;;  %v1196_v32 = vpack.c.bf16 %v401_v24, %v400_v23  ;;  %v478_v35 = vld [vmem:[#allocation3 + $0x30] sm:$0xff]  ;;  %p1795_p4 = scmp.ne.s32.totalorder %s1784_s25, 0 }
  0x6c   : > { %v1208_v34 = vpack.c.bf16 %v715_v28, %v714_v25  ;;  %v479_v36 = vld [vmem:[#allocation3 + $0x38] sm:$0xff]  ;;  %v792_v37 = vld [vmem:[#allocation3 + $0x70] sm:$0xff]  ;;  %v1088_v43 = vld [vmem:[%s1771_s1] ss:$0 sm:$0xff]  ;;  %s1105_s28 = sshll.u32 (%p1795_p4), %s1439_s16, 4 }
  0x6d   : > { %v793_v38 = vld [vmem:[#allocation3 + $0x78] sm:$0xff]  ;;  %v1199_v39 = vpack.c.bf16 %v479_v36, %v478_v35  ;;  %s923_s30 = sadd.s32 (%p1795_p4), %s1435_s15, %s1105_s28 }
  0x6e   : > { %v1211_v40 = vpack.c.bf16 %v793_v38, %v792_v37  ;;  %s1106_s25 = sshll.u32 (%p1795_p4), %s923_s30, 3 }
  0x6f   : > { %v555_v21 = vld [vmem:[#allocation2 + $0x27] sm:$0xff]  ;;  %v908_v22 = vld [vmem:[#allocation2 + $0x2f] sm:$0x1]  ;;  %s925_s23 = scalar_lea.vmem (%p1795_p4), %s1773_s3, %s1106_s25 }
  0x70   : > { %v242_v19 = vld [vmem:[#allocation2 + $0x7] sm:$0xff]  ;;  %v906_v20 = vld [vmem:[#allocation2 + $0xf] sm:$0x1]  ;;  %1166 = vmatmul.mubr.msk.f32.vlgmr.msra.gmra.mrb[0].mxu0 %vm230_vm1, %v555_v21  ;;  %913 = vst.msk [vmem:[#allocation2 + $0x27] sm:$0x1] %vm910_vm3, %v908_v22 }
  0x71   : > { %1138 = vmatmul.mubr.msk.f32.vlgmr.msra.gmra.mrb[0].mxu1 %vm230_vm1, %v242_v19  ;;  %911 = vst.msk [vmem:[#allocation2 + $0x7] sm:$0x1] %vm910_vm3, %v906_v20  ;;  %1206 = vmatpush3.bf16.msra.mxu0 %v1205_v18  ;;  %v398_v26 = vld [vmem:[#allocation2 + $0x17] sm:$0xff]  ;;  %v907_v27 = vld [vmem:[#allocation2 + $0x1f] sm:$0x1]  ;;  %v319_v31 = vld [vmem:[#allocation2 + $0x8] sm:$0xff] }
  0x72   : > { %1194 = vmatpush3.bf16.msra.mxu1 %v1193_v17  ;;  %1144 = vmatprep.mubr.msk.f32.mxu1 %vm1460_vm2, %v1461_v9  ;;  %912 = vst.msk [vmem:[#allocation2 + $0x17] sm:$0x1] %vm910_vm3, %v907_v27  ;;  %v712_v29 = vld [vmem:[#allocation2 + $0x37] sm:$0xff]  ;;  %v909_v30 = vld [vmem:[#allocation2 + $0x3f] sm:$0x1]  ;;  %v633_v33 = vld [vmem:[#allocation2 + $0x28] sm:$0xff] }
  0x73   : > { %1195 = vmatprep.subr.bf16.mxu1 %v1459_v4  ;;  %1172 = vmatprep.mubr.msk.f32.mxu0 %vm1460_vm2, %v1461_v9  ;;  %914 = vst.msk [vmem:[#allocation2 + $0x37] sm:$0x1] %vm910_vm3, %v909_v30  ;;  %v476_v41 = vld [vmem:[#allocation2 + $0x18] sm:$0xff] }
  0x74   : > { %1207 = vmatprep.subr.bf16.mxu0 %v1459_v4  ;;  %v790_v42 = vld [vmem:[#allocation2 + $0x38] sm:$0xff] }
  0x78   : > { %1173 = vmatmul.mubr.msk.f32.vlgmr.msra.gmra.mrb[0].mxu0 %vm230_vm1, %v633_v33 }
  0x79   : > { %1145 = vmatmul.mubr.msk.f32.vlgmr.msra.gmra.mrb[0].mxu1 %vm230_vm1, %v319_v31  ;;  %1209 = vmatpush3.bf16.msra.mxu0 %v1208_v34 }
  0x7a   : > { %1197 = vmatpush3.bf16.msra.mxu1 %v1196_v32  ;;  %1151 = vmatprep.mubr.msk.f32.mxu1 %vm1460_vm2, %v1461_v9 }
  0x7b   : > { %1198 = vmatprep.subr.bf16.mxu1 %v1459_v4  ;;  %1179 = vmatprep.mubr.msk.f32.mxu0 %vm1460_vm2, %v1461_v9 }
  0x7c   : > { %1210 = vmatprep.subr.bf16.mxu0 %v1459_v4 }
  0x80   : > { %1180 = vmatmul.mubr.msk.f32.vlgmr.msra.gmra.mrb[0].mxu0 %vm230_vm1, %v712_v29 }
  0x81   : > { %1152 = vmatmul.mubr.msk.f32.vlgmr.msra.gmra.mrb[0].mxu1 %vm230_vm1, %v398_v26  ;;  %1212 = vmatpush3.bf16.msra.mxu0 %v1211_v40 }
  0x82   : > { %1200 = vmatpush3.bf16.msra.mxu1 %v1199_v39  ;;  %1158 = vmatprep.mubr.msk.f32.mxu1 %vm1460_vm2, %v1461_v9 }
  0x83   : > { %1186 = vmatprep.mubr.msk.f32.mxu0 %vm1460_vm2, %v1461_v9 }
  0x88   : > { %1187 = vmatmul.mubr.msk.f32.vlgmr.msra.gmra.mrb[0].mxu0 %vm230_vm1, %v790_v42 }
  0x89   : > { %1159 = vmatmul.mubr.msk.f32.vlgmr.msra.gmra.mrb[0].mxu1 %vm230_vm1, %v476_v41 }
 0x15b   : > { %v863_v46 = vpop.f32.mrb[0].mxu0 }
 0x15c   : > { %v549_v44 = vpop.f32.mrb[0].mxu1  ;;  %v1188_v48 = vpop.f32.mrb[1].mxu0 }
 0x15d   : > { %v1213_v45 = vadd.f32 %v1088_v43, %v549_v44  ;;  %v1160_v47 = vpop.f32.mrb[1].mxu1 }
 0x15f   : > { %v1214_v49 = vadd.f32 %v1213_v45, %v863_v46 }
 0x161   : > { %881 = vrot.lane.b32.xlu1 %v1214_v49, %s1462_s20  ;;  %871 = vrot.lane.b32.xlu0 %v1214_v49, %s1463_s11  ;;  %869 = vst.msk [vmem:[%s1665_s12] sm:$0xff] %vm868_vm4, %v1214_v49 }
 0x165   : > { %886 = vrot.lane.b32.xlu1 %v1214_v49, %s1464_s7  ;;  %876 = vrot.lane.b32.xlu0 %v1214_v49, %s1465_s21 }
 0x168   : > { %v967_v57 = vld [vmem:[%s1665_s12] sm:$0xff] (%p1795_p4) }
 0x169   : > { %896 = vrot.lane.b32.xlu1 %v1214_v49, %s1466_s29  ;;  %891 = vrot.lane.b32.xlu0 %v1214_v49, %s1467_s9  ;;  %968 = vst [vmem:[%s925_s23] sm:$0xff] (%p1795_p4), %v967_v57 }
 0x16d   : > { %901 = vrot.lane.b32.xlu0 %v1214_v49, %s1468_s10 }
 0x1d3   : > { %v882_v50 = vpop.permute.xlu1 %881  ;;  %v872_v51 = vpop.permute.xlu0 %871 }
 0x1d4   : > { %1099 = vst.msk [vmem:[%s1665_s12 + $0x18] sm:$0xff] %vm868_vm4, %v882_v50  ;;  %1097 = vst.msk [vmem:[%s1665_s12 + $0x8] sm:$0xff] %vm868_vm4, %v872_v51 }
 0x1d7   : > { %v887_v52 = vpop.permute.xlu1 %886  ;;  %v877_v53 = vpop.permute.xlu0 %876 }
 0x1d8   : > { %1100 = vst.msk [vmem:[%s1665_s12 + $0x20] sm:$0xff] %vm868_vm4, %v887_v52  ;;  %1098 = vst.msk [vmem:[%s1665_s12 + $0x10] sm:$0xff] %vm868_vm4, %v877_v53 }
 0x1da   : > { %921 = sbr.rel (!%p1795_p4) target bundleno = 489 (0x1e9), region = 48 }
 0x1db   : > { %v897_v54 = vpop.permute.xlu1 %896  ;;  %v892_v55 = vpop.permute.xlu0 %891  ;;  %v969_v58 = vld [vmem:[%s1665_s12 + $0x8] sm:$0xff] (%p1795_p4)  ;;  %v973_v60 = vld [vmem:[%s1665_s12 + $0x18] sm:$0xff] (%p1795_p4) }
 0x1dc   : > { %1102 = vst.msk [vmem:[%s1665_s12 + $0x30] sm:$0xff] %vm868_vm4, %v897_v54  ;;  %1101 = vst.msk [vmem:[%s1665_s12 + $0x28] sm:$0xff] %vm868_vm4, %v892_v55 }
 0x1dd   : > { %970 = vst [vmem:[%s925_s23 + $0x10] sm:$0xff] (%p1795_p4), %v969_v58  ;;  %974 = vst [vmem:[%s925_s23 + $0x30] sm:$0xff] (%p1795_p4), %v973_v60 }
 0x1df   : > { %v902_v56 = vpop.permute.xlu0 %901  ;;  %v971_v59 = vld [vmem:[%s1665_s12 + $0x10] sm:$0xff] (%p1795_p4)  ;;  %v975_v61 = vld [vmem:[%s1665_s12 + $0x20] sm:$0xff] (%p1795_p4) }
 0x1e0   : > { %1103 = vst.msk [vmem:[%s1665_s12 + $0x38] sm:$0xff] %vm868_vm4, %v902_v56  ;;  %972 = vst [vmem:[%s925_s23 + $0x20] sm:$0xff] (%p1795_p4), %v971_v59 }
 0x1e1   : > { %976 = vst [vmem:[%s925_s23 + $0x40] sm:$0xff] %v975_v61 }
 0x1e3   : > { %v977_v62 = vld [vmem:[%s1665_s12 + $0x28] sm:$0xff]  ;;  %v979_v63 = vld [vmem:[%s1665_s12 + $0x30] sm:$0xff] }
 0x1e4   : > { %978 = vst [vmem:[%s925_s23 + $0x50] sm:$0xff] %v977_v62  ;;  %980 = vst [vmem:[%s925_s23 + $0x60] sm:$0xff] %v979_v63 }
 0x1e7   : > { %v981_v0 = vld [vmem:[%s1665_s12 + $0x38] sm:$0xff] }
 0x1e8   : > { %982 = vst [vmem:[%s925_s23 + $0x70] sm:$0xff] %v981_v0 }
 0x1e9 PF: > { %s17_s19 = sadd.s32 1, %s1451_s19   ;;  %s1796_s12 = smov %s1427_s13 }
 0x1ea   : > { %p14_p11 = scmp.ge.s32.totalorder %s17_s19, 6   ;;  %s1797_s13 = smov %s1431_s14 }
 0x1eb   : > { %s1798_s14 = smov %s1650_s27  ;;  %s1799_s15 = smov %s1443_s17 }
 0x1ec   : > { %s1800_s16 = smov %s1447_s18  ;;  %s1801_s17 = smov %s1804_s4 }
 0x1ed   : > { %s1802_s18 = smov %s1808_s5  ;;  %16 = sbr.rel (!%p14_p11) target bundleno = 6 (0x6), region = 136 }
 0x1f4   :  { %998 = vsyncpa [#allocation4], 1 }
 0x1f5   :  { %1000 = vsyncpa [#allocation4 + $0x1], 1 }
 0x1f6   :  { %1001 = vsyncpa [#allocation6], 1 }
 0x1f7   :  { %1003 = vsyncpa [#allocation6 + $0x1], 1 }

</bundles_post_ra>
